<compile_context>
chip_gen: v7x
topology: tpu7x:2x2x1
jax: 0.10.0
libtpu: 0.0.40
codegen_flags: <defaults>
</compile_context>

<pallas_src>
import jax
import jax.numpy as jnp
from jax.experimental import pallas as pl
from jax.experimental.pallas import tpu as pltpu


def _round_up(x, m):
    return ((x + m - 1) // m) * m


def _ebd_gather_kernel(idx_ref, w_ref, out_ref):
    # idx_ref: (TB, 1) int32   -- indices for this row tile.
    # w_ref:   (D, C)  float   -- full (padded) embedding table, VMEM-resident.
    # out_ref: (TB, C) float   -- gathered rows for this tile.
    tb = out_ref.shape[0]
    d = w_ref.shape[0]
    onehot = (jax.lax.broadcasted_iota(jnp.int32, (tb, d), 1)
              == idx_ref[...]).astype(w_ref.dtype)
    out_ref[...] = jnp.dot(
        onehot, w_ref[...], preferred_element_type=jnp.float32
    ).astype(out_ref.dtype)


def ebd_forward(e, weight):
    """Pallas implementation of EBD.forward(e): out[b, :] = weight[e[b], :]."""
    D, C = weight.shape
    # mirrors e.long(); clamp keeps the in-kernel gather in-bounds.
    # TODO(synk): torch.nn.Embedding raises on out-of-range indices; here
    # out-of-range / negative indices are clamped to [0, D-1] instead.
    idx = jnp.clip(e.astype(jnp.int32).reshape(-1), 0, D - 1)
    B = idx.shape[0]

    # Pad shapes for lane/sublane-dense tiles.
    C_pad = _round_up(C, 128)
    D_pad = _round_up(D, 8)
    # Row tile: single step for tiny B, capped so double-buffered output tiles
    # comfortably fit even v7x's smaller (64 MiB) VMEM for realistic C.
    TB = min(512, _round_up(B, 8))
    B_pad = _round_up(B, TB)
    num_tiles = B_pad // TB

    w = weight
    if (D_pad, C_pad) != (D, C):
        w = jnp.zeros((D_pad, C_pad), weight.dtype).at[:D, :C].set(weight)
    idx2 = jnp.zeros((B_pad, 1), jnp.int32).at[:B, 0].set(idx)

    itemsize = jnp.dtype(weight.dtype).itemsize
    out = pl.pallas_call(
        _ebd_gather_kernel,
        out_shape=jax.ShapeDtypeStruct((B_pad, C_pad), weight.dtype),
        grid_spec=pltpu.PrefetchScalarGridSpec(
            num_scalar_prefetch=0,
            grid=(num_tiles,),
            in_specs=[
                # Per-tile indices (TB, 1): second-last dim multiple of 8,
                # last dim equals full array dim.
                pl.BlockSpec((TB, 1), lambda i: (i, 0)),
                # Full table, constant block index => fetched once, resident.
                pl.BlockSpec((D_pad, C_pad), lambda i: (0, 0)),
            ],
            out_specs=pl.BlockSpec((TB, C_pad), lambda i: (i, 0)),
        ),
        compiler_params=pltpu.CompilerParams(
            dimension_semantics=("parallel",),
        ),
        cost_estimate=pl.CostEstimate(
            flops=2 * B_pad * D_pad * C_pad,
            transcendentals=0,
            bytes_accessed=(D_pad * C_pad + B_pad * C_pad) * itemsize + B_pad * 4,
        ),
    )(idx2, w)

    return out[:B, :C]


class EBD:
    """JAX/Pallas port of domainbed.lib.misc.EBD."""

    def __init__(self, num_domains, num_classes):
        self.num_domains = num_domains
        self.num_classes = num_classes
        self.re_init()

    def re_init(self):
        # torch: self.embedings.weight.data.fill_(1.0)
        self.weight = jnp.full((self.num_domains, self.num_classes),
                               1.0, dtype=jnp.float32)

    def re_init_with_noise(self, noise_sd, key=jax.random.PRNGKey(1)):
        rd = 1.0 + noise_sd * jax.random.normal(
            key, (self.num_domains * self.num_classes,), dtype=jnp.float32)
        self.weight = rd.reshape(-1, self.num_classes)

    def __call__(self, e):
        return ebd_forward(e, self.weight)


if __name__ == "__main__":
    k_e, k_noise, k_e2, k_noise2 = jax.random.split(jax.random.PRNGKey(0), 4)

    # 1) Aligned shapes: C=128 keeps tiles lane-dense with no padding needed.
    num_domains, num_classes, batch = 4, 128, 16
    ebd = EBD(num_domains, num_classes)
    e = jax.random.randint(k_e, (batch,), 0, num_domains, dtype=jnp.int32)

    out = jax.block_until_ready(ebd(e))
    assert out.shape == (batch, num_classes)
    assert out.dtype == jnp.float32
    ref = ebd.weight[e]
    assert jnp.allclose(out, ref), "mismatch vs reference embedding lookup (ones)"

    # Noisy table so the gather check is non-trivial.
    ebd.re_init_with_noise(0.1, key=k_noise)
    out2 = jax.block_until_ready(ebd(e))
    ref2 = ebd.weight[e]
    assert jnp.allclose(out2, ref2), "mismatch vs reference embedding lookup (noise)"

    # 2) Non-aligned shapes (D=3, C=100, B=10) exercise the padding path.
    ebd3 = EBD(3, 100)
    ebd3.re_init_with_noise(0.2, key=k_noise2)
    e3 = jax.random.randint(k_e2, (10,), 0, 3, dtype=jnp.int32)
    out3 = jax.block_until_ready(ebd3(e3))
    ref3 = ebd3.weight[e3]
    assert out3.shape == (10, 100)
    assert jnp.allclose(out3, ref3), "mismatch vs reference embedding lookup (padded)"

    print("KERNEL_OK")
</pallas_src>

<mosaic_0001>
module attributes {stable_mosaic.version = 11 : i64} {
  func.func @_ebd_gather_kernel(%arg0: i32, %arg1: memref<16x1xi32, #tpu.memory_space<vmem>>, %arg2: memref<8x128xf32, #tpu.memory_space<vmem>>, %arg3: memref<16x128xf32, #tpu.memory_space<vmem>>) attributes {dimension_semantics = [#tpu.dimension_semantics<parallel>], iteration_bounds = array<i64: 1>, scalar_prefetch = 0 : i64, scratch_operands = 0 : i64, tpu.core_type = #tpu.core_type<tc>, window_params = [{transform_indices = @transform_0, window_bounds = array<i64: 16, 1>}, {pipeline_mode = #tpu.pipeline_mode<synchronous>, transform_indices = @transform_1, window_bounds = array<i64: 8, 128>}, {transform_indices = @transform_2, window_bounds = array<i64: 16, 128>}]} {
    %0 = tpu.iota {dimensions = array<i32: 1>} : vector<16x8xi32>
    %c0 = arith.constant 0 : index
    %c0_0 = arith.constant 0 : index
    %1 = vector.load %arg1[%c0, %c0_0] : memref<16x1xi32, #tpu.memory_space<vmem>>, vector<16x1xi32>
    %2 = vector.broadcast %1 : vector<16x1xi32> to vector<16x8xi32>
    %3 = arith.cmpi eq, %0, %2 : vector<16x8xi32>
    %4 = arith.extui %3 : vector<16x8xi1> to vector<16x8xi32>
    %5 = arith.sitofp %4 : vector<16x8xi32> to vector<16x8xf32>
    %c0_1 = arith.constant 0 : index
    %c0_2 = arith.constant 0 : index
    %6 = vector.load %arg2[%c0_1, %c0_2] : memref<8x128xf32, #tpu.memory_space<vmem>>, vector<8x128xf32>
    %cst = arith.constant dense<0.000000e+00> : vector<16x128xf32>
    %7 = tpu.matmul %5, %6, %cst {dimension_numbers = #tpu.dot_dimension_numbers<[1], [0], [0], [1], [0, 0, 1, 1], [], []>} : vector<16x8xf32>, vector<8x128xf32>, vector<16x128xf32> -> vector<16x128xf32>
    %c0_3 = arith.constant 0 : index
    %c0_4 = arith.constant 0 : index
    %8 = vector.load %arg3[%c0_3, %c0_4] : memref<16x128xf32, #tpu.memory_space<vmem>>, vector<16x128xf32>
    tpu.vector_store %arg3[%c0_3, %c0_4], %7 {strides = array<i32>} : memref<16x128xf32, #tpu.memory_space<vmem>>, vector<16x128xf32>,
    return
  }
  func.func @transform_0(%arg0: i32) -> (i32, i32) {
    %c0_i32 = arith.constant 0 : i32
    %c0_i32_0 = arith.constant 0 : i32
    return %arg0, %c0_i32 : i32, i32
  }
  func.func @transform_1(%arg0: i32) -> (i32, i32) {
    %c0_i32 = arith.constant 0 : i32
    %c0_i32_0 = arith.constant 0 : i32
    %c0_i32_1 = arith.constant 0 : i32
    return %c0_i32, %c0_i32_0 : i32, i32
  }
  func.func @transform_2(%arg0: i32) -> (i32, i32) {
    %c0_i32 = arith.constant 0 : i32
    %c0_i32_0 = arith.constant 0 : i32
    return %arg0, %c0_i32 : i32, i32
  }
}

</mosaic_0001>

<bundles_post_ra>
// kernel: tpu_custom_call.1
= control target key start
LH: loop header
LB: loop body
LE: loop exit
PB: predicated region body
PF: predicated region fallthrough
CT: control target
= control target key end

     0   :  { %s212_s0 = inlined_call_operand.vmem [shape: s32[16,1], index: 0, kind: input, shape index: {}]   ;;  %s213_s1 = inlined_call_operand.vmem [shape: f32[8,128], index: 1, kind: input, shape index: {}]   ;;  %s214_s2 = inlined_call_operand.hbm [shape: f32[16,128], index: 2, kind: output, shape index: {}]  }
   0x1   :  { %v14_v0 = vld [vmem:[%s212_s0] sm:$0xff] }
   0x2   :  { %7 = vsyncpa [#allocation3], 0  ;;  %v171_v1 = vmov 0   ;;  %v15_v2 = vld [vmem:[%s212_s0 + $0x8] sm:$0xff]  ;;  %v28_v3 = vld [vmem:[%s213_s1] sm:$0xff]  ;;  %v12_v4 = vlaneseq  ;;  %vm29_vm0 = vcmask 64512  }
   0x3   :  { %146 = vset.pattern.permute.xlu0 %v171_v1  ;;  %136 = vmatprep.subr.mxu0 %v28_v3  ;;  %v172_v7 = vmov 0.0   ;;  %s173_s0 = smov [#allocation2]  }
   0x4   :  { %17 = vperm.xlu0 %146, %v14_v0   ;;  %137 = vmatpush3.msra.mxu0 %v28_v3  ;;  %v13_v5 = vand.u32 127, %v12_v4  ;;  %s118_s15 = sshll.u32 %s173_s0, 4  ;;  %s119_s15 = int_to_ptr.vmem [resolvable:$true] %s118_s15 }
   0x5   :  { %s147_s1 = scalar_lea.vmem %s119_s15, 256  ;;  %p152_p1 = scmp.lt.s32.totalorder %s119_s15, %s119_s15 }
   0x6   :  { %p148_p0 = scmp.ne.s32.totalorder %s119_s15, %s147_s1  ;;  %p153_p2 = scmp.lt.s32.totalorder %s147_s1, %s147_s1 }
   0x8   :  { %20 = vperm.xlu0 %146, %v15_v2   ;;  %p154_p3 = por %p153_p2, %p152_p1 }
   0xa   :  { %p155_p4 = pnand %p154_p3, %p148_p0 }
  0x83   :  { %v18_v6 = vpop.permute.xlu0 %17 }
  0x84   :  { %vm22_vm1 = vcmp.eq.s32.totalorder %v13_v5, %v18_v6 }
  0x85   :  { %v129_v8 = vsel %vm22_vm1, 1.0, %v172_v7 }
  0x86   :  { %138 = vmatprep.mubr.msk.f32.mxu0 %vm29_vm0, %v129_v8 }
  0x87   :  { %v21_v9 = vpop.permute.xlu0 %20 }
  0x88   :  { %vm23_vm2 = vcmp.eq.s32.totalorder %v13_v5, %v21_v9 }
  0x89   :  { %v130_v10 = vsel %vm23_vm2, 1.0, %v172_v7 }
  0x8a   :  { %139 = vmatmul.mubr.msk.f32.vlgmr.msra.gmra.mrb[0].mxu0 %vm29_vm0, %v130_v10 }
 0x15d   :  { %v140_v11 = vpop.f32.mrb[0].mxu0 }
 0x15e   :  { %112 = vst [vmem:[#allocation2 + $0x8] sm:$0xff] %v140_v11  ;;  %v102_v12 = vpop.f32.mrb[1].mxu0 }
 0x15f   :  { %111 = vst [vmem:[#allocation2] sm:$0xff] %v102_v12 }
 0x160   :  { %158 = shalt.err (!%p155_p4)
}
 0x161   :  { %s159_s18 = scalar_lea.hbm %s214_s2, 256 }
 0x162   :  { %p160_p5 = scmp.ne.s32.totalorder %s214_s2, %s159_s18  ;;  %p163_p6 = scmp.lt.u32.totalorder %s159_s18, %s214_s2 }
 0x164   :  { %p165_p7 = pnand %p163_p6, %p160_p5 }
 0x166   :  { %168 = shalt.err (!%p165_p7)
}
 0x167   :  { %s174_s23 = smov 128   ;;  %s175_s24 = smov 8  }
 0x168   :  { %124 = dma.vmem_to_hbm [thread:$0]  %s119_s15, 256, %s214_s2, [#allocation3], %s174_s23, %s174_s23, %s175_s24  }
 0x169   :  { %169 = dma.done.wait [#allocation3], 256  }
 0x16a   :  { %170 = vsyncadd [#allocation3], 4294967040 }
 0x16b   :  { %128 = vsyncpa [#allocation3], 1 }

</bundles_post_ra>
